<compile_context>
chip_gen: v6e
topology: v6e:2x2x1
jax: 0.10.0
libtpu: 0.0.40
codegen_flags: <defaults>
</compile_context>

<pallas_src>
import jax
import jax.numpy as jnp
from jax.experimental import pallas as pl
from jax.experimental.pallas import tpu as pltpu

# --- module "parameters" (from FocalDiceLoss.__init__ defaults) ---
ALPHA = 0.5       # FocalDiceLoss(alpha=0.5) -> uniform alpha_t
GAMMA = 1.5       # implemented as z * sqrt(z) (one sqrt instead of pow)
SOFT = False      # dice uses torch.round(output)
SMOOTH = 1e-07
EPS = 1e-07
# TODO(synk): PyTorch FocalLoss indexes self.alpha[0]/[1]; FocalDiceLoss passes a
# scalar 0.5 which would error in torch — we implement the evident intent
# alpha_t == 0.5 for both classes.

# Flag-gated fast path: for strictly binary targets bce == log(p_t) (one log instead
# of two).  Default False to preserve exact soft-target semantics.
BINARY_TARGET_FAST_PATH = False

# Bound the per-step lane-fold unroll (tk <= 128 * MAX_LANE_GROUPS).
_MAX_LANE_GROUPS = 128


def _round_up(x, m):
    return ((x + m - 1) // m) * m


def _tpu_budgets():
    """Returns (per-input block budget bytes, vmem_limit_bytes or None, #TCs/chip)."""
    kind = ""
    try:
        kind = (getattr(jax.devices()[0], "device_kind", "") or "").lower()
    except Exception:
        pass
    if "v7" in kind or "7x" in kind:
        # 64 MiB VMEM / 3.2 TB/s HBM: ~5 MiB blocks (-> ~20 MiB double-buffered
        # inputs) cut per-step overhead to <10% while staying well inside VMEM.
        return 5 * 1024 * 1024, 48 << 20, 2
    if "v6" in kind:
        # 128 MiB VMEM / ~1.4 TB/s: 8 MiB blocks; raise the scoped-VMEM limit.
        return 8 * 1024 * 1024, 64 << 20, 1
    # v5e (16 MiB scoped default) or unknown backend: stay conservative.
    return 3 * 1024 * 1024, None, 1


def _choose_tiles(R, K, itemsize, budget, num_tc):
    """Pick (tr, tk) block dims: tk multiple of 128 (or K if K<128), tr multiple
    of 8 (or R if R<8), never larger than the array dims, sized to the budget."""
    if K < 128:
        tk = K
    else:
        tk_budget = (budget // (8 * itemsize)) // 128 * 128
        tk = max(128, min(tk_budget, (K // 128) * 128, 128 * _MAX_LANE_GROUPS))
    if R < 8:
        tr = R
    else:
        tr_budget = (budget // max(1, tk * itemsize)) // 8 * 8
        tr = max(8, min(tr_budget, (R // 8) * 8))
        # Megacore: guarantee >=2 row blocks so the "parallel" axis shards across TCs.
        if num_tc >= 2 and R > 8 and pl.cdiv(R, tr) < 2:
            tr = min(max(8, _round_up(pl.cdiv(R, 2), 8)), (R // 8) * 8)
    return tr, tk


def _lane_fold(x, width):
    """(tr, tk) -> (tr, width) partial sums via a tree of static lane slices.

    Pure VPU vreg adds (lane-tile-aligned static slices), no XLU reduction."""
    if x.shape[-1] == width:
        return x
    parts = [x[:, j * width:(j + 1) * width] for j in range(x.shape[-1] // width)]
    while len(parts) > 1:
        nxt = [parts[a] + parts[a + 1] for a in range(0, len(parts) - 1, 2)]
        if len(parts) % 2:
            nxt.append(parts[-1])
        parts = nxt
    return parts[0]


def _make_kernel(K, tk, acc_w, binary_fast):
    mask_k = (K % tk) != 0  # last lane block extends past K -> mask it

    def kernel(o_ref, t_ref, facc_ref, iacc_ref, uacc_ref):
        k = pl.program_id(1)

        @pl.when(k == 0)
        def _init():
            facc_ref[...] = jnp.zeros_like(facc_ref)
            iacc_ref[...] = jnp.zeros_like(iacc_ref)
            uacc_ref[...] = jnp.zeros_like(uacc_ref)

        o = o_ref[...].astype(jnp.float32)   # (tr, tk) tile of (N*C, H*W)
        t = t_ref[...].astype(jnp.float32)

        if mask_k:
            lane = jax.lax.broadcasted_iota(jnp.int32, o.shape, 1)
            valid = (k * tk + lane) < K
            # Finite neutral fill: o=0, t=0 -> zero dice contribution; focal is
            # explicitly masked below.  Also stops NaN garbage from OOB lanes.
            o = jnp.where(valid, o, 0.0)
            t = jnp.where(valid, t, 0.0)

        # ---------------- Focal loss (lane-blocked partial sums) ----------------
        oc = jnp.clip(o, EPS, 1.0 - EPS)
        z = t + oc * (1.0 - 2.0 * t)                 # == 1 - p_t
        if binary_fast:
            bce = jnp.log(1.0 - z)                   # == log(p_t); exact for t in {0,1}
        else:
            log0 = jnp.log(oc)                       # oc clipped -> no extra clamp needed
            log1 = jnp.log(1.0 - oc)
            bce = log1 + t * (log0 - log1)           # == t*log0 + (1-t)*log1 (soft-safe)
        focal_elem = (z * jnp.sqrt(z)) * bce         # z**1.5 with a single sqrt
        if mask_k:
            focal_elem = jnp.where(valid, focal_elem, 0.0)
        facc_ref[...] += _lane_fold(focal_elem, acc_w)

        # ---------------- Dice loss (lane-blocked partial sums) -----------------
        o_d = o if SOFT else jnp.round(o)            # torch.round == half-to-even
        iacc_ref[...] += _lane_fold(o_d * t, acc_w)
        uacc_ref[...] += _lane_fold(o_d + t, acc_w)

    return kernel


def focal_dice_loss(output, target, *, binary_target=BINARY_TARGET_FAST_PATH):
    # output, target: NCHW arrays with matching shapes (any float/int dtype).
    N, C, H, W = output.shape
    R, K = N * C, H * W
    o2 = output.reshape(R, K)     # keep original dtype -> half the HBM traffic for bf16
    t2 = target.reshape(R, K)

    itemsize = max(o2.dtype.itemsize, t2.dtype.itemsize)
    budget, vmem_limit, num_tc = _tpu_budgets()
    tr, tk = _choose_tiles(R, K, itemsize, budget, num_tc)
    acc_w = 128 if K >= 128 else K
    grid = (pl.cdiv(R, tr), pl.cdiv(K, tk))

    cost = pl.CostEstimate(
        flops=20 * R * K,
        transcendentals=3 * R * K,
        bytes_accessed=R * K * (o2.dtype.itemsize + t2.dtype.itemsize)
        + 3 * R * acc_w * 4,
    )
    cp_kwargs = dict(dimension_semantics=("parallel", "arbitrary"))
    if vmem_limit is not None:
        cp_kwargs["vmem_limit_bytes"] = vmem_limit

    out_struct = jax.ShapeDtypeStruct((R, acc_w), jnp.float32)
    out_spec = pl.BlockSpec((tr, acc_w), lambda i, k: (i, 0))  # resident accumulator

    focal_part, inter_part, union_part = pl.pallas_call(
        _make_kernel(K, tk, acc_w, binary_target),
        out_shape=(out_struct, out_struct, out_struct),
        grid_spec=pltpu.PrefetchScalarGridSpec(
            num_scalar_prefetch=0,
            grid=grid,
            in_specs=[
                pl.BlockSpec((tr, tk), lambda i, k: (i, k)),
                pl.BlockSpec((tr, tk), lambda i, k: (i, k)),
            ],
            out_specs=[out_spec, out_spec, out_spec],
        ),
        compiler_params=pltpu.CompilerParams(**cp_kwargs),
        cost_estimate=cost,
    )(o2, t2)

    # Tiny final combine (cross-lane reduce + alpha / mean scales) on (R, 128) data.
    focal = (-ALPHA / (R * K)) * jnp.sum(focal_part)
    inter = jnp.sum(inter_part, axis=1)
    union = jnp.sum(union_part, axis=1)
    dice = jnp.mean(1.0 - (2.0 * inter + SMOOTH) / (union + SMOOTH))
    return focal + dice


def focal_dice_loss_ref(output, target):
    """Pure-JAX reference mirroring the PyTorch forward."""
    o = output.astype(jnp.float32)
    t = target.astype(jnp.float32)
    oc = jnp.clip(o, EPS, 1.0 - EPS)
    log0 = jnp.maximum(jnp.log(oc), -100.0)
    log1 = jnp.maximum(jnp.log(1.0 - oc), -100.0)
    bce = t * log0 + (1.0 - t) * log1
    p_t = t * oc + (1.0 - t) * (1.0 - oc)
    focal = jnp.mean(-(ALPHA * (1.0 - p_t) ** GAMMA * bce))
    o_d = o if SOFT else jnp.round(o)
    inter = jnp.sum(o_d * t, axis=(2, 3))
    union = jnp.sum(o_d + t, axis=(2, 3))
    dice = jnp.mean(1.0 - (2.0 * inter + SMOOTH) / (union + SMOOTH))
    return focal + dice


if __name__ == "__main__":
    key = jax.random.PRNGKey(0)
    k1, k2 = jax.random.split(key)
    N, C, H, W = 2, 4, 16, 16
    # predicted probabilities in [0, 1] and a binary target mask
    output = jax.random.uniform(k1, (N, C, H, W), dtype=jnp.float32)
    target = (jax.random.uniform(k2, (N, C, H, W), dtype=jnp.float32) > 0.5).astype(
        jnp.float32
    )

    loss = jax.block_until_ready(focal_dice_loss(output, target))
    ref = jax.block_until_ready(focal_dice_loss_ref(output, target))
    assert jnp.allclose(loss, ref, rtol=2e-5, atol=2e-5), (loss, ref)
    print("KERNEL_OK")
</pallas_src>

<mosaic_0001>
module attributes {stable_mosaic.version = 11 : i64} {
  func.func @kernel(%arg0: i32, %arg1: i32, %arg2: memref<8x256xf32, #tpu.memory_space<vmem>>, %arg3: memref<8x256xf32, #tpu.memory_space<vmem>>, %arg4: memref<8x128xf32, #tpu.memory_space<vmem>>, %arg5: memref<8x128xf32, #tpu.memory_space<vmem>>, %arg6: memref<8x128xf32, #tpu.memory_space<vmem>>) attributes {dimension_semantics = [#tpu.dimension_semantics<parallel>, #tpu.dimension_semantics<arbitrary>], iteration_bounds = array<i64: 1, 1>, scalar_prefetch = 0 : i64, scratch_operands = 0 : i64, tpu.core_type = #tpu.core_type<tc>, window_params = [{transform_indices = @transform_0, window_bounds = array<i64: 8, 256>}, {transform_indices = @transform_1, window_bounds = array<i64: 8, 256>}, {transform_indices = @transform_2, window_bounds = array<i64: 8, 128>}, {transform_indices = @transform_3, window_bounds = array<i64: 8, 128>}, {transform_indices = @transform_4, window_bounds = array<i64: 8, 128>}]} {
    %c0_i32 = arith.constant 0 : i32
    %0 = arith.cmpi eq, %arg1, %c0_i32 : i32
    %1 = arith.extui %0 : i1 to i32
    %c0_i32_0 = arith.constant 0 : i32
    %2 = arith.cmpi ne, %1, %c0_i32_0 : i32
    scf.if %2 {
      %cst_20 = arith.constant 0.000000e+00 : f32
      %46 = vector.broadcast %cst_20 : f32 to vector<8x128xf32>
      %c0_21 = arith.constant 0 : index
      %c0_22 = arith.constant 0 : index
      %47 = vector.load %arg4[%c0_21, %c0_22] : memref<8x128xf32, #tpu.memory_space<vmem>>, vector<8x128xf32>
      tpu.vector_store %arg4[%c0_21, %c0_22], %46 {strides = array<i32>} : memref<8x128xf32, #tpu.memory_space<vmem>>, vector<8x128xf32>,
      %cst_23 = arith.constant 0.000000e+00 : f32
      %48 = vector.broadcast %cst_23 : f32 to vector<8x128xf32>
      %c0_24 = arith.constant 0 : index
      %c0_25 = arith.constant 0 : index
      %49 = vector.load %arg5[%c0_24, %c0_25] : memref<8x128xf32, #tpu.memory_space<vmem>>, vector<8x128xf32>
      tpu.vector_store %arg5[%c0_24, %c0_25], %48 {strides = array<i32>} : memref<8x128xf32, #tpu.memory_space<vmem>>, vector<8x128xf32>,
      %cst_26 = arith.constant 0.000000e+00 : f32
      %50 = vector.broadcast %cst_26 : f32 to vector<8x128xf32>
      %c0_27 = arith.constant 0 : index
      %c0_28 = arith.constant 0 : index
      %51 = vector.load %arg6[%c0_27, %c0_28] : memref<8x128xf32, #tpu.memory_space<vmem>>, vector<8x128xf32>
      tpu.vector_store %arg6[%c0_27, %c0_28], %50 {strides = array<i32>} : memref<8x128xf32, #tpu.memory_space<vmem>>, vector<8x128xf32>,
    } else {
    }
    %c0 = arith.constant 0 : index
    %c0_1 = arith.constant 0 : index
    %3 = vector.load %arg2[%c0, %c0_1] : memref<8x256xf32, #tpu.memory_space<vmem>>, vector<8x256xf32>
    %c0_2 = arith.constant 0 : index
    %c0_3 = arith.constant 0 : index
    %4 = vector.load %arg3[%c0_2, %c0_3] : memref<8x256xf32, #tpu.memory_space<vmem>>, vector<8x256xf32>
    %cst = arith.constant 1.000000e-07 : f32
    %cst_4 = arith.constant 0.99999988 : f32
    %5 = vector.broadcast %cst : f32 to vector<8x256xf32>
    %6 = arith.maximumf %5, %3 : vector<8x256xf32>
    %7 = vector.broadcast %cst_4 : f32 to vector<8x256xf32>
    %8 = arith.minimumf %7, %6 : vector<8x256xf32>
    %cst_5 = arith.constant 2.000000e+00 : f32
    %9 = vector.broadcast %cst_5 : f32 to vector<8x256xf32>
    %10 = arith.mulf %9, %4 : vector<8x256xf32>
    %cst_6 = arith.constant 1.000000e+00 : f32
    %11 = vector.broadcast %cst_6 : f32 to vector<8x256xf32>
    %12 = arith.subf %11, %10 : vector<8x256xf32>
    %13 = arith.mulf %8, %12 : vector<8x256xf32>
    %14 = arith.addf %4, %13 : vector<8x256xf32>
    %15 = math.log %8 : vector<8x256xf32>
    %cst_7 = arith.constant 1.000000e+00 : f32
    %16 = vector.broadcast %cst_7 : f32 to vector<8x256xf32>
    %17 = arith.subf %16, %8 : vector<8x256xf32>
    %18 = math.log %17 : vector<8x256xf32>
    %19 = arith.subf %15, %18 : vector<8x256xf32>
    %20 = arith.mulf %4, %19 : vector<8x256xf32>
    %21 = arith.addf %18, %20 : vector<8x256xf32>
    %22 = math.sqrt %14 : vector<8x256xf32>
    %23 = arith.mulf %14, %22 : vector<8x256xf32>
    %24 = arith.mulf %23, %21 : vector<8x256xf32>
    %c0_8 = arith.constant 0 : index
    %c0_9 = arith.constant 0 : index
    %25 = vector.load %arg4[%c0_8, %c0_9] : memref<8x128xf32, #tpu.memory_space<vmem>>, vector<8x128xf32>
    %26 = vector.extract_strided_slice %24 {offsets = [0, 0], sizes = [8, 128], strides = [1, 1]} : vector<8x256xf32> to vector<8x128xf32>
    %27 = vector.extract_strided_slice %24 {offsets = [0, 128], sizes = [8, 128], strides = [1, 1]} : vector<8x256xf32> to vector<8x128xf32>
    %28 = arith.addf %26, %27 : vector<8x128xf32>
    %29 = arith.addf %25, %28 : vector<8x128xf32>
    %c0_10 = arith.constant 0 : index
    %c0_11 = arith.constant 0 : index
    %30 = vector.load %arg4[%c0_10, %c0_11] : memref<8x128xf32, #tpu.memory_space<vmem>>, vector<8x128xf32>
    tpu.vector_store %arg4[%c0_10, %c0_11], %29 {strides = array<i32>} : memref<8x128xf32, #tpu.memory_space<vmem>>, vector<8x128xf32>,
    %31 = math.roundeven %3 : vector<8x256xf32>
    %c0_12 = arith.constant 0 : index
    %c0_13 = arith.constant 0 : index
    %32 = vector.load %arg5[%c0_12, %c0_13] : memref<8x128xf32, #tpu.memory_space<vmem>>, vector<8x128xf32>
    %33 = arith.mulf %31, %4 : vector<8x256xf32>
    %34 = vector.extract_strided_slice %33 {offsets = [0, 0], sizes = [8, 128], strides = [1, 1]} : vector<8x256xf32> to vector<8x128xf32>
    %35 = vector.extract_strided_slice %33 {offsets = [0, 128], sizes = [8, 128], strides = [1, 1]} : vector<8x256xf32> to vector<8x128xf32>
    %36 = arith.addf %34, %35 : vector<8x128xf32>
    %37 = arith.addf %32, %36 : vector<8x128xf32>
    %c0_14 = arith.constant 0 : index
    %c0_15 = arith.constant 0 : index
    %38 = vector.load %arg5[%c0_14, %c0_15] : memref<8x128xf32, #tpu.memory_space<vmem>>, vector<8x128xf32>
    tpu.vector_store %arg5[%c0_14, %c0_15], %37 {strides = array<i32>} : memref<8x128xf32, #tpu.memory_space<vmem>>, vector<8x128xf32>,
    %c0_16 = arith.constant 0 : index
    %c0_17 = arith.constant 0 : index
    %39 = vector.load %arg6[%c0_16, %c0_17] : memref<8x128xf32, #tpu.memory_space<vmem>>, vector<8x128xf32>
    %40 = arith.addf %31, %4 : vector<8x256xf32>
    %41 = vector.extract_strided_slice %40 {offsets = [0, 0], sizes = [8, 128], strides = [1, 1]} : vector<8x256xf32> to vector<8x128xf32>
    %42 = vector.extract_strided_slice %40 {offsets = [0, 128], sizes = [8, 128], strides = [1, 1]} : vector<8x256xf32> to vector<8x128xf32>
    %43 = arith.addf %41, %42 : vector<8x128xf32>
    %44 = arith.addf %39, %43 : vector<8x128xf32>
    %c0_18 = arith.constant 0 : index
    %c0_19 = arith.constant 0 : index
    %45 = vector.load %arg6[%c0_18, %c0_19] : memref<8x128xf32, #tpu.memory_space<vmem>>, vector<8x128xf32>
    tpu.vector_store %arg6[%c0_18, %c0_19], %44 {strides = array<i32>} : memref<8x128xf32, #tpu.memory_space<vmem>>, vector<8x128xf32>,
    return
  }
  func.func @transform_0(%arg0: i32, %arg1: i32) -> (i32, i32) {
    %c0_i32 = arith.constant 0 : i32
    return %arg0, %arg1 : i32, i32
  }
  func.func @transform_1(%arg0: i32, %arg1: i32) -> (i32, i32) {
    %c0_i32 = arith.constant 0 : i32
    return %arg0, %arg1 : i32, i32
  }
  func.func @transform_2(%arg0: i32, %arg1: i32) -> (i32, i32) {
    %c0_i32 = arith.constant 0 : i32
    %c0_i32_0 = arith.constant 0 : i32
    return %arg0, %c0_i32 : i32, i32
  }
  func.func @transform_3(%arg0: i32, %arg1: i32) -> (i32, i32) {
    %c0_i32 = arith.constant 0 : i32
    %c0_i32_0 = arith.constant 0 : i32
    return %arg0, %c0_i32 : i32, i32
  }
  func.func @transform_4(%arg0: i32, %arg1: i32) -> (i32, i32) {
    %c0_i32 = arith.constant 0 : i32
    %c0_i32_0 = arith.constant 0 : i32
    return %arg0, %c0_i32 : i32, i32
  }
}

</mosaic_0001>

<bundles_post_ra>
// kernel: tpu_custom_call.1
= control target key start
LH: loop header
LB: loop body
LE: loop exit
PB: predicated region body
PF: predicated region fallthrough
CT: control target
= control target key end

     0   :  { %10 = vsyncpa [#allocation3], 0  ;;  %s383_s0 = inlined_call_operand.hbm [shape: f32[8,256], index: 0, kind: input, shape index: {}]   ;;  %s384_s1 = inlined_call_operand.hbm [shape: f32[8,256], index: 1, kind: input, shape index: {}]   ;;  %s385_s2 = inlined_call_operand.hbm [shape: f32[8,128], index: 2, kind: output, shape index: {0}]   ;;  %s386_s3 = inlined_call_operand.hbm [shape: f32[8,128], index: 3, kind: output, shape index: {1}]   ;;  %s387_s4 = inlined_call_operand.hbm [shape: f32[8,128], index: 4, kind: output, shape index: {2}]  }
   0x1   :  { %11 = vsyncpa [#allocation6], 0 }
   0x2   :  { %12 = vsyncpa [#allocation4], 0 }
   0x3   :  { %13 = vsyncpa [#allocation9], 0  ;;  %s300_s15 = smov [#allocation2]   ;;  %s301_s17 = smov [#allocation5]  }
   0x4   :  { %s20_s16 = sshll.u32 %s300_s15, 4  ;;  %s30_s18 = sshll.u32 %s301_s17, 4  ;;  %s21_s16 = int_to_ptr.vmem [resolvable:$true] %s20_s16  ;;  %s31_s18 = int_to_ptr.vmem [resolvable:$true] %s30_s18 }
   0x5   :  { %s200_s19 = scalar_lea.vmem %s21_s16, 256  ;;  %p205_p1 = scmp.lt.s32.totalorder %s21_s16, %s21_s16 }
   0x6   :  { %p201_p0 = scmp.ne.s32.totalorder %s21_s16, %s200_s19  ;;  %p206_p2 = scmp.lt.s32.totalorder %s200_s19, %s200_s19 }
   0x8   :  { %p207_p3 = por %p206_p2, %p205_p1 }
   0xa   :  { %p208_p4 = pnand %p207_p3, %p201_p0 }
   0xc   :  { %211 = shalt.err (!%p208_p4)
}
   0xd   :  { %23 = dma.hbm_to_vmem [thread:$0]  %s383_s0, 256, %s21_s16, [#allocation3]  }
   0xe   :  { %s220_s22 = scalar_lea.vmem %s31_s18, 256  ;;  %p225_p6 = scmp.lt.s32.totalorder %s31_s18, %s31_s18 }
   0xf   :  { %p221_p5 = scmp.ne.s32.totalorder %s31_s18, %s220_s22  ;;  %p226_p7 = scmp.lt.s32.totalorder %s220_s22, %s220_s22 }
  0x11   :  { %p227_p8 = por %p226_p7, %p225_p6 }
  0x13   :  { %p228_p9 = pnand %p227_p8, %p221_p5 }
  0x15   :  { %231 = shalt.err (!%p228_p9)
}
  0x16   :  { %33 = dma.hbm_to_vmem [thread:$0]  %s384_s1, 256, %s31_s18, [#allocation6]  }
  0x17   :  { %292 = dma.done.wait [#allocation3], 256  }
  0x18   :  { %293 = vsyncadd [#allocation3], 4294967040 }
  0x19   :  { %294 = dma.done.wait [#allocation6], 256  }
  0x1a   :  { %295 = vsyncadd [#allocation6], 4294967040  ;;  %v47_v0 = vld [vmem:[#allocation2] sm:$0xff]  ;;  %v48_v1 = vld [vmem:[#allocation2 + $0x8] sm:$0xff]  ;;  %s302_s0 = smov [#allocation8]   ;;  %s303_s25 = smov [#allocation10]  }
  0x1b   :  { %v336_v2 = vld [vmem:[#allocation5] sm:$0xff]  ;;  %v338_v3 = vld [vmem:[#allocation5 + $0x8] sm:$0xff]  ;;  %v51_v4 = vmax.f32 %v47_v0, 1e-07  ;;  %v52_v5 = vmax.f32 %v48_v1, 1e-07  ;;  %v160_v7 = vcvt.f32.s32 %v47_v0  ;;  %v168_v18 = vcvt.f32.s32 %v48_v1 }
  0x1c   :  { %v55_v6 = vmul.f32 2.0, %v336_v2  ;;  %v56_v8 = vmul.f32 2.0, %v338_v3  ;;  %v158_v9 = vand.u32 2147483647, %v47_v0  ;;  %v163_v10 = vand.u32 2147483648, %v47_v0  ;;  %s131_s1 = sshll.u32 %s302_s0, 4  ;;  %s132_s1 = int_to_ptr.vmem [resolvable:$true] %s131_s1 }
  0x1d   :  { %v53_v11 = vmin.f32 %v51_v4, 0.9999999  ;;  %v54_v12 = vmin.f32 %v52_v5, 0.9999999  ;;  %v161_v14 = vcvt.s32.f32 %v160_v7  ;;  %v166_v17 = vand.u32 2147483647, %v48_v1  ;;  %p237_p11 = scmp.lt.s32.totalorder %s132_s1, %s132_s1 }
  0x1e   :  { %v57_v13 = vsub.f32 1.0, %v55_v6  ;;  %v58_v15 = vsub.f32 1.0, %v56_v8  ;;  %vm342_vm0 = vcmp.lt.f32.partialorder %v158_v9, 8388608.0  ;;  %v171_v21 = vand.u32 2147483648, %v48_v1  ;;  %s141_s26 = sshll.u32 %s303_s25, 4  ;;  %s232_s27 = scalar_lea.vmem %s132_s1, 128  ;;  %s142_s26 = int_to_ptr.vmem [resolvable:$true] %s141_s26 }
  0x1f   :  { %v162_v20 = vand.u32 2147483647, %v161_v14  ;;  %180 = vlog2.f32 %v53_v11  ;;  %v169_v23 = vcvt.s32.f32 %v168_v18  ;;  %v67_v24 = vsub.f32 1.0, %v53_v11  ;;  %p233_p10 = scmp.ne.s32.totalorder %s132_s1, %s232_s27  ;;  %p238_p12 = scmp.lt.s32.totalorder %s232_s27, %s232_s27 }
  0x20   :  { %v59_v19 = vmul.f32 %v57_v13, %v53_v11  ;;  %v60_v22 = vmul.f32 %v58_v15, %v54_v12  ;;  %182 = vlog2.f32 %v54_v12  ;;  %v68_v27 = vsub.f32 1.0, %v54_v12 }
  0x21   :  { %v164_v26 = vor.u32 %v163_v10, %v162_v20  ;;  %v170_v29 = vand.u32 2147483647, %v169_v23  ;;  %184 = vlog2.f32 %v67_v24  ;;  %vm167_vm1 = vcmp.lt.f32.partialorder %v166_v17, 8388608.0  ;;  %p239_p13 = por %p238_p12, %p237_p11 }
  0x22   :  { %v347_v25 = vadd.f32 %v59_v19, %v336_v2  ;;  %v350_v28 = vadd.f32 %v60_v22, %v338_v3  ;;  %186 = vlog2.f32 %v68_v27 }
  0x23   :  { %v165_v30 = vsel %vm342_vm0, %v164_v26, %v47_v0  ;;  %v172_v31 = vor.u32 %v171_v21, %v170_v29  ;;  %p240_p0 = pnand %p239_p13, %p233_p10 }
  0x24   :  { %188 = vrsqrt.f32 %v347_v25  ;;  %v104_v32 = vmul.f32 %v165_v30, %v336_v2  ;;  %v110_v34 = vadd.f32 %v165_v30, %v336_v2 }
  0x25   :  { %190 = vrsqrt.f32 %v350_v28  ;;  %v173_v33 = vsel %vm167_vm1, %v172_v31, %v48_v1 }
  0x26   :  { %v105_v35 = vmul.f32 %v173_v33, %v338_v3  ;;  %v111_v36 = vadd.f32 %v173_v33, %v338_v3 }
  0x28   :  { %v106_v37 = vadd.f32 %v105_v35, %v104_v32  ;;  %v112_v38 = vadd.f32 %v111_v36, %v110_v34 }
  0x2a   :  { %108 = vst [vmem:[#allocation8] sm:$0xff] %v106_v37  ;;  %114 = vst [vmem:[#allocation10] sm:$0xff] %v112_v38 }
  0x2c   :  { %v181_v39 = vpop.eup %180 }
  0x2d   :  { %v183_v40 = vpop.eup %182  ;;  %v64_v41 = vmul.f32 0.6931472, %v181_v39 }
  0x2e   :  { %243 = shalt.err (!%p240_p0)
}
  0x2f   :  { %134 = dma.vmem_to_hbm [thread:$0]  %s132_s1, 128, %s386_s3, [#allocation9]   ;;  %v185_v42 = vpop.eup %184  ;;  %v66_v43 = vmul.f32 0.6931472, %v183_v40 }
  0x30   :  { %s252_s30 = scalar_lea.vmem %s142_s26, 128  ;;  %p257_p2 = scmp.lt.s32.totalorder %s142_s26, %s142_s26 }
  0x31   :  { %p253_p1 = scmp.ne.s32.totalorder %s142_s26, %s252_s30  ;;  %p258_p3 = scmp.lt.s32.totalorder %s252_s30, %s252_s30 }
  0x33   :  { %p259_p4 = por %p258_p3, %p257_p2 }
  0x35   :  { %p260_p5 = pnand %p259_p4, %p253_p1 }
  0x37   :  { %263 = shalt.err (!%p260_p5)
}
  0x38   :  { %144 = dma.vmem_to_hbm [thread:$0]  %s142_s26, 128, %s387_s4, [#allocation9]   ;;  %v187_v44 = vpop.eup %186  ;;  %v70_v45 = vmul.f32 0.6931472, %v185_v42  ;;  %vm81_vm2 = vcmp.eq.f32.partialorder %v347_v25, inf  ;;  %vm83_vm3 = vcmp.eq.f32.partialorder %v347_v25, 0.0 }
  0x39   :  { %v189_v46 = vpop.eup %188  ;;  %v72_v47 = vmul.f32 0.6931472, %v187_v44  ;;  %v84_v48 = vand.u32 2147483648, %v347_v25  ;;  %vm88_vm4 = vcmp.eq.f32.partialorder %v350_v28, inf  ;;  %v91_v52 = vand.u32 2147483648, %v350_v28  ;;  %s304_s3 = smov [#allocation7]  }
  0x3a   :  { %v191_v49 = vpop.eup %190  ;;  %v73_v50 = vsub.f32 %v64_v41, %v70_v45  ;;  %v80_v51 = vmul.f32 %v189_v46, %v347_v25  ;;  %vm90_vm5 = vcmp.eq.f32.partialorder %v350_v28, 0.0  ;;  %s121_s4 = sshll.u32 %s304_s3, 4  ;;  %s122_s4 = int_to_ptr.vmem [resolvable:$true] %s121_s4 }
  0x3b   :  { %v74_v53 = vsub.f32 %v66_v43, %v72_v47  ;;  %v87_v54 = vmul.f32 %v191_v49, %v350_v28  ;;  %s272_s7 = scalar_lea.vmem %s122_s4, 128  ;;  %p277_p7 = scmp.lt.s32.totalorder %s122_s4, %s122_s4 }
  0x3c   :  { %v75_v55 = vmul.f32 %v73_v50, %v336_v2  ;;  %v82_v56 = vsel %vm81_vm2, %v347_v25, %v80_v51  ;;  %p273_p6 = scmp.ne.s32.totalorder %s122_s4, %s272_s7  ;;  %p278_p8 = scmp.lt.s32.totalorder %s272_s7, %s272_s7 }
  0x3d   :  { %v76_v57 = vmul.f32 %v74_v53, %v338_v3  ;;  %v85_v58 = vsel %vm83_vm3, %v84_v48, %v82_v56  ;;  %v89_v59 = vsel %vm88_vm4, %v350_v28, %v87_v54 }
  0x3e   :  { %v77_v60 = vadd.f32 %v75_v55, %v70_v45  ;;  %v92_v61 = vsel %vm90_vm5, %v91_v52, %v89_v59  ;;  %v93_v62 = vmul.f32 %v85_v58, %v347_v25  ;;  %p279_p9 = por %p278_p8, %p277_p7 }
  0x3f   :  { %v78_v63 = vadd.f32 %v76_v57, %v72_v47  ;;  %v94_v0 = vmul.f32 %v92_v61, %v350_v28 }
  0x40   :  { %v95_v1 = vmul.f32 %v93_v62, %v77_v60  ;;  %p280_p10 = pnand %p279_p9, %p273_p6 }
  0x41   :  { %v96_v4 = vmul.f32 %v94_v0, %v78_v63 }
  0x43   :  { %v98_v5 = vadd.f32 %v96_v4, %v95_v1 }
  0x45   :  { %100 = vst [vmem:[#allocation7] sm:$0xff] %v98_v5 }
  0x46   :  { %283 = shalt.err (!%p280_p10)
}
  0x47   :  { %124 = dma.vmem_to_hbm [thread:$0]  %s122_s4, 128, %s385_s2, [#allocation4]  }
  0x48   :  { %296 = dma.done.wait [#allocation4], 128  }
  0x49   :  { %297 = vsyncadd [#allocation4], 4294967168 }
  0x4a   :  { %298 = dma.done.wait [#allocation9], 256  }
  0x4b   :  { %299 = vsyncadd [#allocation9], 4294967040 }
  0x4c   :  { %154 = vsyncpa [#allocation3], 1 }
  0x4d   :  { %155 = vsyncpa [#allocation6], 1 }
  0x4e   :  { %156 = vsyncpa [#allocation4], 1 }
  0x4f   :  { %157 = vsyncpa [#allocation9], 1 }

</bundles_post_ra>
